<compile_context>
chip_gen: v7x
topology: tpu7x:2x2x1
jax: 0.10.0
libtpu: 0.0.40
codegen_flags: <defaults>
</compile_context>

<pallas_src>
import jax
import jax.numpy as jnp
from jax.experimental import pallas as pl
from jax.experimental.pallas import tpu as pltpu


# Stay well under the default scoped-VMEM budget on every generation
# (v7x default scoped limit is 32 MiB); leave headroom for padding.
_VMEM_STAGE_LIMIT_BYTES = 4 * 1024 * 1024


def _concat_self_vmem_kernel(x_ref, o_ref, buf, sem):
    """1x HBM read + 2x HBM write: stage x in VMEM, fan out to both halves."""
    n = x_ref.shape[0]
    # Stage the input into VMEM exactly once.
    cp_in = pltpu.make_async_copy(x_ref, buf, sem.at[0])
    cp_in.start()
    cp_in.wait()
    # Two independent VMEM->HBM writes; start both so the DMA engine overlaps
    # them, then wait on both.
    cp_lo = pltpu.make_async_copy(buf, o_ref.at[0:n], sem.at[1])
    cp_hi = pltpu.make_async_copy(buf, o_ref.at[n:2 * n], sem.at[2])
    cp_lo.start()
    cp_hi.start()
    cp_lo.wait()
    cp_hi.wait()


def _concat_self_hbm_kernel(x_ref, o_ref, sem):
    """Fallback for large x: two overlapped HBM->HBM copies, zero VMEM."""
    n = x_ref.shape[0]
    cp_lo = pltpu.make_async_copy(x_ref, o_ref.at[0:n], sem.at[0])
    cp_hi = pltpu.make_async_copy(x_ref, o_ref.at[n:2 * n], sem.at[1])
    cp_lo.start()
    cp_hi.start()
    cp_lo.wait()
    cp_hi.wait()


def concat_self(x: jax.Array) -> jax.Array:
    """Equivalent of torch.concat([x, x]) (concatenation along axis 0)."""
    n = x.shape[0]
    out_shape = jax.ShapeDtypeStruct((2 * n,) + tuple(x.shape[1:]), x.dtype)
    nbytes = x.size * jnp.dtype(x.dtype).itemsize

    if nbytes <= _VMEM_STAGE_LIMIT_BYTES:
        # Minimal-traffic path: 1 read + 2 writes of x's bytes.
        return pl.pallas_call(
            _concat_self_vmem_kernel,
            out_shape=out_shape,
            in_specs=[pl.BlockSpec(memory_space=pl.ANY)],
            out_specs=pl.BlockSpec(memory_space=pl.ANY),
            scratch_shapes=[
                pltpu.VMEM(tuple(x.shape), x.dtype),
                pltpu.SemaphoreType.DMA((3,)),
            ],
        )(x)

    # Large-input fallback: raw HBM refs, no VMEM footprint, no block
    # constraints -> scales to arbitrarily large x on every TPU generation.
    return pl.pallas_call(
        _concat_self_hbm_kernel,
        out_shape=out_shape,
        in_specs=[pl.BlockSpec(memory_space=pl.ANY)],
        out_specs=pl.BlockSpec(memory_space=pl.ANY),
        scratch_shapes=[pltpu.SemaphoreType.DMA((2,))],
    )(x)


if __name__ == "__main__":
    # Matches the reference script's input: x = torch.randn(2, 2)
    key = jax.random.PRNGKey(0)
    x = jax.random.normal(key, (2, 2), dtype=jnp.float32)

    out = jax.jit(concat_self)(x)
    jax.block_until_ready(out)

    ref = jnp.concatenate([x, x], axis=0)
    assert out.shape == (4, 2), out.shape
    assert jnp.allclose(out, ref), "mismatch vs jnp.concatenate reference"

    # Lane-dense mid-size shape -> exercises the VMEM-staging path.
    x_mid = jax.random.normal(jax.random.PRNGKey(1), (256, 512), dtype=jnp.float32)
    out_mid = jax.jit(concat_self)(x_mid)
    jax.block_until_ready(out_mid)
    assert out_mid.shape == (512, 512)
    assert jnp.allclose(out_mid, jnp.concatenate([x_mid, x_mid], axis=0))

    # Large shape (4 MiB+ of f32) -> exercises the HBM->HBM fallback path.
    x_big = jax.random.normal(jax.random.PRNGKey(2), (2048, 1024), dtype=jnp.float32)
    out_big = jax.jit(concat_self)(x_big)
    jax.block_until_ready(out_big)
    assert out_big.shape == (4096, 1024)
    assert jnp.allclose(out_big, jnp.concatenate([x_big, x_big], axis=0))

    print("KERNEL_OK")
</pallas_src>

<mosaic_0001>
module attributes {stable_mosaic.version = 11 : i64} {
  func.func @_concat_self_vmem_kernel(%arg0: memref<2x2xf32, #tpu.memory_space<any>>, %arg1: memref<4x2xf32, #tpu.memory_space<any>>, %arg2: memref<2x2xf32, #tpu.memory_space<vmem>>, %arg3: memref<3x!tpu.dma_semaphore, #tpu.memory_space<semaphore_mem>>) attributes {dimension_semantics = [], scalar_prefetch = 0 : i64, scratch_operands = 2 : i64, tpu.core_type = #tpu.core_type<tc>} {
    %c0_i32 = arith.constant 0 : i32
    %0 = tpu.memref_slice %arg3[%c0_i32] : memref<3x!tpu.dma_semaphore, #tpu.memory_space<semaphore_mem>> -> memref<1x!tpu.dma_semaphore, #tpu.memory_space<semaphore_mem>>
    %1 = tpu.memref_squeeze %0 : memref<1x!tpu.dma_semaphore, #tpu.memory_space<semaphore_mem>> -> memref<!tpu.dma_semaphore, #tpu.memory_space<semaphore_mem>>
    tpu.enqueue_dma source(%arg0 : memref<2x2xf32, #tpu.memory_space<any>>) target(%arg2 : memref<2x2xf32, #tpu.memory_space<vmem>>) target_semaphore(%1 : memref<!tpu.dma_semaphore, #tpu.memory_space<semaphore_mem>>)
    %c0_i32_0 = arith.constant 0 : i32
    %2 = tpu.memref_slice %arg3[%c0_i32_0] : memref<3x!tpu.dma_semaphore, #tpu.memory_space<semaphore_mem>> -> memref<1x!tpu.dma_semaphore, #tpu.memory_space<semaphore_mem>>
    %3 = tpu.memref_squeeze %2 : memref<1x!tpu.dma_semaphore, #tpu.memory_space<semaphore_mem>> -> memref<!tpu.dma_semaphore, #tpu.memory_space<semaphore_mem>>
    tpu.wait_dma2 semaphore(%3 : memref<!tpu.dma_semaphore, #tpu.memory_space<semaphore_mem>>) src(%arg0 : memref<2x2xf32, #tpu.memory_space<any>>) dst(%arg2 : memref<2x2xf32, #tpu.memory_space<vmem>>)
    %c1_i32 = arith.constant 1 : i32
    %c0_i32_1 = arith.constant 0 : i32
    %c0_i32_2 = arith.constant 0 : i32
    %4 = tpu.memref_slice %arg1[%c0_i32_1, %c0_i32_2] : memref<4x2xf32, #tpu.memory_space<any>> -> memref<2x2xf32, #tpu.memory_space<any>>
    %5 = tpu.memref_slice %arg3[%c1_i32] : memref<3x!tpu.dma_semaphore, #tpu.memory_space<semaphore_mem>> -> memref<1x!tpu.dma_semaphore, #tpu.memory_space<semaphore_mem>>
    %6 = tpu.memref_squeeze %5 : memref<1x!tpu.dma_semaphore, #tpu.memory_space<semaphore_mem>> -> memref<!tpu.dma_semaphore, #tpu.memory_space<semaphore_mem>>
    tpu.enqueue_dma source(%arg2 : memref<2x2xf32, #tpu.memory_space<vmem>>) target(%4 : memref<2x2xf32, #tpu.memory_space<any>>) target_semaphore(%6 : memref<!tpu.dma_semaphore, #tpu.memory_space<semaphore_mem>>)
    %c2_i32 = arith.constant 2 : i32
    %c2_i32_3 = arith.constant 2 : i32
    %c0_i32_4 = arith.constant 0 : i32
    %7 = tpu.memref_slice %arg1[%c2_i32_3, %c0_i32_4] : memref<4x2xf32, #tpu.memory_space<any>> -> memref<2x2xf32, #tpu.memory_space<any>>
    %8 = tpu.memref_slice %arg3[%c2_i32] : memref<3x!tpu.dma_semaphore, #tpu.memory_space<semaphore_mem>> -> memref<1x!tpu.dma_semaphore, #tpu.memory_space<semaphore_mem>>
    %9 = tpu.memref_squeeze %8 : memref<1x!tpu.dma_semaphore, #tpu.memory_space<semaphore_mem>> -> memref<!tpu.dma_semaphore, #tpu.memory_space<semaphore_mem>>
    tpu.enqueue_dma source(%arg2 : memref<2x2xf32, #tpu.memory_space<vmem>>) target(%7 : memref<2x2xf32, #tpu.memory_space<any>>) target_semaphore(%9 : memref<!tpu.dma_semaphore, #tpu.memory_space<semaphore_mem>>)
    %c1_i32_5 = arith.constant 1 : i32
    %c0_i32_6 = arith.constant 0 : i32
    %c0_i32_7 = arith.constant 0 : i32
    %10 = tpu.memref_slice %arg1[%c0_i32_6, %c0_i32_7] : memref<4x2xf32, #tpu.memory_space<any>> -> memref<2x2xf32, #tpu.memory_space<any>>
    %11 = tpu.memref_slice %arg3[%c1_i32_5] : memref<3x!tpu.dma_semaphore, #tpu.memory_space<semaphore_mem>> -> memref<1x!tpu.dma_semaphore, #tpu.memory_space<semaphore_mem>>
    %12 = tpu.memref_squeeze %11 : memref<1x!tpu.dma_semaphore, #tpu.memory_space<semaphore_mem>> -> memref<!tpu.dma_semaphore, #tpu.memory_space<semaphore_mem>>
    tpu.wait_dma2 semaphore(%12 : memref<!tpu.dma_semaphore, #tpu.memory_space<semaphore_mem>>) src(%arg2 : memref<2x2xf32, #tpu.memory_space<vmem>>) dst(%10 : memref<2x2xf32, #tpu.memory_space<any>>)
    %c2_i32_8 = arith.constant 2 : i32
    %c2_i32_9 = arith.constant 2 : i32
    %c0_i32_10 = arith.constant 0 : i32
    %13 = tpu.memref_slice %arg1[%c2_i32_9, %c0_i32_10] : memref<4x2xf32, #tpu.memory_space<any>> -> memref<2x2xf32, #tpu.memory_space<any>>
    %14 = tpu.memref_slice %arg3[%c2_i32_8] : memref<3x!tpu.dma_semaphore, #tpu.memory_space<semaphore_mem>> -> memref<1x!tpu.dma_semaphore, #tpu.memory_space<semaphore_mem>>
    %15 = tpu.memref_squeeze %14 : memref<1x!tpu.dma_semaphore, #tpu.memory_space<semaphore_mem>> -> memref<!tpu.dma_semaphore, #tpu.memory_space<semaphore_mem>>
    tpu.wait_dma2 semaphore(%15 : memref<!tpu.dma_semaphore, #tpu.memory_space<semaphore_mem>>) src(%arg2 : memref<2x2xf32, #tpu.memory_space<vmem>>) dst(%13 : memref<2x2xf32, #tpu.memory_space<any>>)
    return
  }
}

</mosaic_0001>

<bundles_post_ra>
// kernel: concat_self.1
= control target key start
LH: loop header
LB: loop body
LE: loop exit
PB: predicated region body
PF: predicated region fallthrough
CT: control target
= control target key end

     0   :  { %s190_s6 = smov [#allocation2]   ;;  %s219_s0 = inlined_call_operand.hbm [shape: f32[2,2], index: 0, kind: input, shape index: {}]   ;;  %s220_s1 = inlined_call_operand.vmem [shape: f32[4,2], index: 1, kind: output, shape index: {}]  }
   0x1   :  { %s13_s7 = sshll.u32 %s190_s6, 4  ;;  %s162_s10 = scalar_lea.hbm %s219_s0, 32  ;;  %s14_s7 = int_to_ptr.vmem [resolvable:$true] %s13_s7 }
   0x2   :  { %p163_p0 = scmp.ne.s32.totalorder %s219_s0, %s162_s10  ;;  %p166_p1 = scmp.lt.u32.totalorder %s162_s10, %s219_s0 }
   0x4   :  { %p168_p2 = pnand %p166_p1, %p163_p0 }
   0x6   :  { %171 = shalt.err (!%p168_p2)  }
   0x7   :  { %s172_s15 = scalar_lea.vmem %s14_s7, 32  ;;  %p177_p4 = scmp.lt.s32.totalorder %s14_s7, %s14_s7 }
   0x8   :  { %p173_p3 = scmp.ne.s32.totalorder %s14_s7, %s172_s15  ;;  %p178_p5 = scmp.lt.s32.totalorder %s172_s15, %s172_s15 }
   0xa   :  { %p179_p6 = por %p178_p5, %p177_p4 }
   0xc   :  { %p180_p7 = pnand %p179_p6, %p173_p3 }
   0xe   :  { %183 = shalt.err (!%p180_p7)  }
   0xf   :  { %16 = dma.hbm_to_vmem [thread:$0]  %s219_s0, 32, %s14_s7, [#allocation3] }
  0x10   :  { %184 = dma.done.wait [#allocation3], 32 }
  0x11   :  { %185 = vsyncadd [#allocation3], 4294967264  ;;  %v38_v0 = vld [vmem:[#allocation2] sm:$0x3] }
  0x12   :  { %39 = vst [vmem:[%s220_s1] sm:$0x3] %v38_v0 }
  0x13   :  { %64 = vsyncadd [#allocation3 + $0x1], 32  ;;  %v84_v1 = vld [vmem:[#allocation2] sm:$0x3] }
  0x14   :  { %157 = vst [vmem:[%s220_s1 + $0x2] sm:$0x3] %v84_v1 }
  0x15   :  { %110 = vsyncadd [#allocation3 + $0x2], 32 }
  0x16   :  { %186 = dma.done.wait [#allocation3 + $0x1], 32 }
  0x17   :  { %187 = vsyncadd [#allocation3 + $0x1], 4294967264 }
  0x18   :  { %188 = dma.done.wait [#allocation3 + $0x2], 32 }
  0x19   :  { %189 = vsyncadd [#allocation3 + $0x2], 4294967264 }
  0x1a   :  { %115 = vsyncmov [#allocation3] }
  0x1d   :  { %s116_s0 = vpop.sfrf %115 }
  0x1e   :  { %p158_p8 = scmp.ne.s32.totalorder %s116_s0, 0 }
  0x20   :  { %120 = shalt.err (%p158_p8)  }
  0x21   :  { %122 = vsyncmov [#allocation3 + $0x1] }
  0x24   :  { %s123_s22 = vpop.sfrf %122 }
  0x25   :  { %p159_p9 = scmp.ne.s32.totalorder %s123_s22, 0 }
  0x27   :  { %127 = shalt.err (%p159_p9)  }
  0x28   :  { %129 = vsyncmov [#allocation3 + $0x2] }
  0x2b   :  { %s130_s23 = vpop.sfrf %129 }
  0x2c   :  { %p160_p10 = scmp.ne.s32.totalorder %s130_s23, 0 }
  0x2e   :  { %134 = shalt.err (%p160_p10)  }

</bundles_post_ra>
